<compile_context>
chip_gen: v7x
topology: tpu7x:2x2x1
jax: 0.10.0
libtpu: 0.0.40
codegen_flags: <defaults>
</compile_context>

<pallas_src>
import jax
import jax.numpy as jnp
from jax import lax
from jax.experimental import pallas as pl
from jax.experimental.pallas import tpu as pltpu


def small_phi_kernel(x_ref, w1_ref, aux_ref, b2_ref, o_ref):
    # fc1: contract x[B, I] with PyTorch-layout w1[H, I] over I (no transpose emitted).
    h = lax.dot_general(
        x_ref[...], w1_ref[...],
        dimension_numbers=(((1,), (1,)), ((), ())),
        preferred_element_type=jnp.float32,
    )                                       # [B, H]
    h = h + aux_ref[0:1, :]                 # + b1 (row 0 of aux), broadcast over batch
    # tanhshrink: z - tanh(z)   (tanh -> EUP slot, subtract -> VPU)
    a = h - jnp.tanh(h)
    # fc2 with output_size == 1: VPU multiply + lane reduction; skips an MXU
    # pass that would only have one useful output column.
    out = jnp.sum(a * aux_ref[1:2, :], axis=-1, keepdims=True)   # [B, 1]
    out = out + b2_ref[0, 0]                # scalar fc2 bias from SMEM
    o_ref[...] = out.astype(o_ref.dtype)


def prepare_params(w1, b1, w2, b2):
    """One-time repack of PyTorch-layout params (NOT on the per-call hot path).

    w1: [H, I]  -> kept as-is (kernel contracts over I directly).
    b1: [H], w2: [1, H] -> aux: [2, H] VMEM tile (row 0 = b1, row 1 = fc2 weight).
    b2: [1]     -> (1, 1) SMEM scalar.
    """
    assert w2.shape[0] == 1, "kernel specialises fc2 to output_size == 1"
    aux = jnp.stack([b1, w2[0]], axis=0)    # [2, H]
    b2_smem = b2.reshape(1, 1)
    return w1, aux, b2_smem


@jax.jit
def small_phi_apply(x, w1, aux, b2_smem):
    B = x.shape[0]
    return pl.pallas_call(
        small_phi_kernel,
        out_shape=jax.ShapeDtypeStruct((B, 1), x.dtype),
        in_specs=[
            pl.BlockSpec(memory_space=pltpu.MemorySpace.VMEM),   # x   [B, I]
            pl.BlockSpec(memory_space=pltpu.MemorySpace.VMEM),   # w1  [H, I]
            pl.BlockSpec(memory_space=pltpu.MemorySpace.VMEM),   # aux [2, H]
            pl.BlockSpec(memory_space=pltpu.MemorySpace.SMEM),   # b2  (1, 1)
        ],
        out_specs=pl.BlockSpec(memory_space=pltpu.MemorySpace.VMEM),
    )(x, w1, aux, b2_smem)
    # TODO(synk): at large batch, add a grid over B (>=512-row blocks, weights
    # kept full-array resident) and dimension_semantics=("parallel",) so v7x's
    # second TensorCore participates; pointless at B=8.


def small_phi_ref(x, w1, b1, w2, b2):
    h = x @ w1.T + b1
    a = h - jnp.tanh(h)
    return a @ w2.T + b2


if __name__ == "__main__":
    key = jax.random.PRNGKey(0)

    # SmallPhi(input_size=16, output_size=1, hidden_size=10), batch=8
    batch, input_size, hidden_size, output_size = 8, 16, 10, 1

    k = jax.random.split(key, 5)
    # Deterministic init mimicking nn.Linear default: U(-1/sqrt(fan_in), +1/sqrt(fan_in))
    lim1 = 1.0 / (input_size ** 0.5)
    lim2 = 1.0 / (hidden_size ** 0.5)
    w1 = jax.random.uniform(k[0], (hidden_size, input_size), jnp.float32, -lim1, lim1)
    b1 = jax.random.uniform(k[1], (hidden_size,), jnp.float32, -lim1, lim1)
    w2 = jax.random.uniform(k[2], (output_size, hidden_size), jnp.float32, -lim2, lim2)
    b2 = jax.random.uniform(k[3], (output_size,), jnp.float32, -lim2, lim2)
    x = jax.random.normal(k[4], (batch, input_size), jnp.float32)

    # One-time parameter repack (kept off the per-call hot path).
    w1_k, aux, b2_smem = prepare_params(w1, b1, w2, b2)

    out = small_phi_apply(x, w1_k, aux, b2_smem)
    out = jax.block_until_ready(out)

    ref = small_phi_ref(x, w1, b1, w2, b2)
    assert out.shape == (batch, output_size)
    assert jnp.allclose(out, ref, atol=1e-5, rtol=1e-5), "mismatch vs reference"

    print("KERNEL_OK")
</pallas_src>

<mosaic_0001>
module attributes {stable_mosaic.version = 11 : i64} {
  func.func @small_phi_kernel(%arg0: memref<8x16xf32, #tpu.memory_space<vmem>>, %arg1: memref<10x16xf32, #tpu.memory_space<vmem>>, %arg2: memref<2x10xf32, #tpu.memory_space<vmem>>, %arg3: memref<1x1xf32, #tpu.memory_space<smem>>, %arg4: memref<8x1xf32, #tpu.memory_space<vmem>>) attributes {dimension_semantics = [], scalar_prefetch = 0 : i64, scratch_operands = 0 : i64, tpu.core_type = #tpu.core_type<tc>} {
    %c0 = arith.constant 0 : index
    %c0_0 = arith.constant 0 : index
    %0 = vector.load %arg0[%c0, %c0_0] : memref<8x16xf32, #tpu.memory_space<vmem>>, vector<8x16xf32>
    %c0_1 = arith.constant 0 : index
    %c0_2 = arith.constant 0 : index
    %1 = vector.load %arg1[%c0_1, %c0_2] : memref<10x16xf32, #tpu.memory_space<vmem>>, vector<10x16xf32>
    %cst = arith.constant dense<0.000000e+00> : vector<8x10xf32>
    %2 = tpu.matmul %0, %1, %cst {dimension_numbers = #tpu.dot_dimension_numbers<[1], [1], [0], [0], [0, 0, 1, 0], [], []>} : vector<8x16xf32>, vector<10x16xf32>, vector<8x10xf32> -> vector<8x10xf32>
    %c0_3 = arith.constant 0 : index
    %c0_4 = arith.constant 0 : index
    %3 = vector.load %arg2[%c0_3, %c0_4] : memref<2x10xf32, #tpu.memory_space<vmem>>, vector<1x10xf32>
    %4 = vector.broadcast %3 : vector<1x10xf32> to vector<8x10xf32>
    %5 = arith.addf %2, %4 : vector<8x10xf32>
    %6 = math.tanh %5 : vector<8x10xf32>
    %7 = arith.subf %5, %6 : vector<8x10xf32>
    %c1 = arith.constant 1 : index
    %c0_5 = arith.constant 0 : index
    %8 = vector.load %arg2[%c1, %c0_5] : memref<2x10xf32, #tpu.memory_space<vmem>>, vector<1x10xf32>
    %9 = vector.broadcast %8 : vector<1x10xf32> to vector<8x10xf32>
    %10 = arith.mulf %7, %9 : vector<8x10xf32>
    %cst_6 = arith.constant dense<0.000000e+00> : vector<8xf32>
    %11 = vector.multi_reduction <add>, %10, %cst_6 [1] : vector<8x10xf32> to vector<8xf32>
    %12 = vector.shape_cast %11 : vector<8xf32> to vector<8x1xf32>
    %c0_7 = arith.constant 0 : index
    %c0_8 = arith.constant 0 : index
    %13 = memref.load %arg3[%c0_7, %c0_8] : memref<1x1xf32, #tpu.memory_space<smem>>
    %14 = vector.broadcast %13 : f32 to vector<8x1xf32>
    %15 = arith.addf %12, %14 : vector<8x1xf32>
    %c0_9 = arith.constant 0 : index
    %c0_10 = arith.constant 0 : index
    %16 = vector.load %arg4[%c0_9, %c0_10] : memref<8x1xf32, #tpu.memory_space<vmem>>, vector<8x1xf32>
    tpu.vector_store %arg4[%c0_9, %c0_10], %15 {strides = array<i32>} : memref<8x1xf32, #tpu.memory_space<vmem>>, vector<8x1xf32>,
    return
  }
}

</mosaic_0001>

<bundles_post_ra>
// kernel: small_phi_apply.1
= control target key start
LH: loop header
LB: loop body
LE: loop exit
PB: predicated region body
PF: predicated region fallthrough
CT: control target
= control target key end

     0   :  { %10 = vsyncpa [#allocation4], 0  ;;  %s306_s0 = inlined_call_operand.hbm [shape: f32[8,16], index: 0, kind: input, shape index: {}]   ;;  %s307_s1 = inlined_call_operand.hbm [shape: f32[10,16], index: 1, kind: input, shape index: {}]   ;;  %s308_s2 = inlined_call_operand.vmem [shape: f32[2,10], index: 2, kind: input, shape index: {}]   ;;  %s309_s3 = inlined_call_operand.<no memory space> [shape: f32[1,1], index: 3, kind: input, shape index: {}]   ;;  %s310_s4 = inlined_call_operand.vmem [shape: f32[8,1], index: 4, kind: output, shape index: {}]  }
   0x1   :  { %11 = vsyncpa [#allocation6], 0  ;;  %s231_s15 = smov [#allocation3]   ;;  %s232_s17 = smov [#allocation5]  }
   0x2   :  { %s18_s16 = sshll.u32 %s231_s15, 4  ;;  %s27_s18 = sshll.u32 %s232_s17, 4  ;;  %s19_s16 = int_to_ptr.vmem [resolvable:$true] %s18_s16  ;;  %s263_s18 = int_to_ptr.vmem [resolvable:$true] %s27_s18 }
   0x3   :  { %s183_s21 = scalar_lea.hbm %s306_s0, 128 }
   0x4   :  { %p184_p0 = scmp.ne.s32.totalorder %s306_s0, %s183_s21  ;;  %p187_p1 = scmp.lt.u32.totalorder %s183_s21, %s306_s0 }
   0x6   :  { %p189_p2 = pnand %p187_p1, %p184_p0 }
   0x8   :  { %192 = shalt.err (!%p189_p2)
}
   0x9   :  { %s193_s26 = scalar_lea.vmem %s19_s16, 128  ;;  %p198_p4 = scmp.lt.s32.totalorder %s19_s16, %s19_s16 }
   0xa   :  { %p194_p3 = scmp.ne.s32.totalorder %s19_s16, %s193_s26  ;;  %p199_p5 = scmp.lt.s32.totalorder %s193_s26, %s193_s26 }
   0xc   :  { %p200_p6 = por %p199_p5, %p198_p4 }
   0xe   :  { %p201_p7 = pnand %p200_p6, %p194_p3 }
  0x10   :  { %204 = shalt.err (!%p201_p7)
}
  0x11   :  { %21 = dma.hbm_to_vmem [thread:$0]  %s306_s0, 128, %s19_s16, [#allocation4]  }
  0x12   :  { %s205_s5 = scalar_lea.hbm %s307_s1, 256 }
  0x13   :  { %p206_p8 = scmp.ne.s32.totalorder %s307_s1, %s205_s5  ;;  %p209_p9 = scmp.lt.u32.totalorder %s205_s5, %s307_s1 }
  0x15   :  { %p211_p10 = pnand %p209_p9, %p206_p8 }
  0x17   :  { %214 = shalt.err (!%p211_p10)
}
  0x18   :  { %s215_s10 = scalar_lea.vmem %s263_s18, 256  ;;  %p220_p12 = scmp.lt.s32.totalorder %s263_s18, %s263_s18 }
  0x19   :  { %p216_p11 = scmp.ne.s32.totalorder %s263_s18, %s215_s10  ;;  %p221_p13 = scmp.lt.s32.totalorder %s215_s10, %s215_s10 }
  0x1b   :  { %p222_p0 = por %p221_p13, %p220_p12 }
  0x1d   :  { %p223_p1 = pnand %p222_p0, %p216_p11 }
  0x1f   :  { %226 = shalt.err (!%p223_p1)
}
  0x20   :  { %s233_s0 = smov 128   ;;  %s234_s11 = smov 8  }
  0x21   :  { %33 = dma.hbm_to_vmem [thread:$0]  %s307_s1, 256, %s263_s18, [#allocation6], %s233_s0, %s233_s0, %s234_s11  }
  0x22   :  { %227 = dma.done.wait [#allocation4], 128  }
  0x23   :  { %228 = vsyncadd [#allocation4], 4294967168 }
  0x24   :  { %229 = dma.done.wait [#allocation6], 256  }
  0x25   :  { %230 = vsyncadd [#allocation6], 4294967040  ;;  %v235_v0 = vmov 0.0|0.0   ;;  %vm236_vm0 = vmmov 0   ;;  %v237_v1 = vmov 0.0   ;;  %vm52_vm1 = vcmask 130048  }
  0x26   :  { %170 = vmatprep.subr.bf16.mxu0 %v235_v0  ;;  %167 = vmatprep.mubr.msk.f32.mxu0 %vm236_vm0, %v237_v1  ;;  %v45_v2 = vld [vmem:[#allocation5] sm:$0xff]  ;;  %v46_v3 = vld [vmem:[#allocation5 + $0x8] sm:$0x3]  ;;  %vm172_vm2 = vmpackc.low %vm52_vm1, %vm52_vm1  ;;  %vm140_vm3 = vcmask 80896   ;;  %v145_v15 = vstv %s309_s3  ;;  %vm147_vm4 = vcmask 7168  }
  0x27   :  { %v171_v4 = vpack.c.bf16 %v46_v3, %v45_v2  ;;  %v44_v5 = vld [vmem:[#allocation3] sm:$0xff] }
  0x28   :  { %v155_v6 = vld [vmem:[%s308_s2] ss:$0 sm:$0xff]  ;;  %v159_v11 = vld [vmem:[%s308_s2 + $0x1] ss:$0 sm:$0xff] }
  0x29   :  { %173 = vmatpush3.bf16.xpose.msk.msra.mxu0 %vm172_vm2, %v171_v4 }
  0x30   :  { %168 = vmatmul.mubr.msk.f32.vlgmr.msra.gmra.mrb[0].mxu0 %vm52_vm1, %v44_v5 }
 0x103   :  { %v128_v7 = vpop.f32.mrb[0].mxu0 }
 0x104   :  { %v129_v8 = vadd.f32 %v155_v6, %v128_v7  ;;  %v169_v9 = vpop.f32.mrb[1].mxu0 }
 0x106   :  { %181 = vtanh.f32 %v129_v8 }
 0x110   :  { %v182_v10 = vpop.eup %181 }
 0x111   :  { %v133_v12 = vsub.f32 %v129_v8, %v182_v10 }
 0x113   :  { %v139_v13 = vmul.f32 %v159_v11, %v133_v12 }
 0x115   :  { %v141_v14 = vsel %vm140_vm3, %v139_v13, 0.0 }
 0x116   :  { %142 = vadd.xlane.f32.xlu0 %v141_v14 }
 0x1a3   :  { %v143_v16 = vpop.xlane.xlu0 %142 }
 0x1a4   :  { %v146_v17 = vadd.f32 %v145_v15, %v143_v16 }
 0x1a6   :  { %148 = vst.msk [vmem:[%s310_s4] sm:$0xff] %vm147_vm4, %v146_v17 }
 0x1a7   :  { %153 = vsyncpa [#allocation4], 1 }
 0x1a8   :  { %154 = vsyncpa [#allocation6], 1 }

</bundles_post_ra>
